<compile_context>
chip_gen: v7x
topology: tpu7x:2x2x1
jax: 0.10.0
libtpu: 0.0.40
codegen_flags: <defaults>
</compile_context>

<pallas_src>
import numpy as np
import jax
import jax.numpy as jnp
from jax.experimental import pallas as pl
from jax.experimental.pallas import tpu as pltpu

# ----------------------------- sizes (synthetic SMPL) ------------------------
B = 2            # batch
V = 128          # number of mesh vertices (small synthetic mesh)
J = 24           # SMPL joints
L = 10           # num_betas
P = (J - 1) * 9  # 207 = pose-feature dimension
C = L + P        # 217 = stacked blend coefficients
V3 = V * 3

# standard SMPL kinematic tree (parents[0] is the root and never indexed)
SMPL_PARENTS = np.array(
    [0, 0, 0, 0, 1, 2, 3, 4, 5, 6, 7, 8, 9, 9, 9, 12, 13, 14, 16, 17, 18, 19,
     20, 21], dtype=np.int32)

_VMEM = pl.BlockSpec(memory_space=pltpu.MemorySpace.VMEM)
_SMEM = pl.BlockSpec(memory_space=pltpu.MemorySpace.SMEM)


# ----------------------------- fused Pallas kernel ---------------------------
def _lbs_fused_kernel(coefs_ref, wstack_ref, vtemp_ref, at_ref, wT_ref,
                      trans_ref, vposed_ref, verts_ref):
    # ---- blendshapes: v_posed = v_template + [betas|pose_feat] @ [S ; P] ----
    # one K=217 MXU pass, output (B, 3V) coordinate-major (lane-dense).
    v_posed = vtemp_ref[...] + jnp.dot(
        coefs_ref[...], wstack_ref[...], preferred_element_type=jnp.float32)
    vposed_ref[...] = v_posed                       # unmasked lane-dense store

    # ---- per-vertex transforms, all batches in one matmul -------------------
    # t_all[b*16 + m, v] = sum_j A[b, j, m] * W[v, j]   -> (B*16, V), N=V=128
    t_all = jnp.dot(at_ref[...], wT_ref[...],
                    preferred_element_type=jnp.float32)

    # ---- skinning: per-lane FMAs over 128-lane rows + lane-dense stores -----
    for b in range(B):
        vx = v_posed[b:b + 1, 0 * V:1 * V]
        vy = v_posed[b:b + 1, 1 * V:2 * V]
        vz = v_posed[b:b + 1, 2 * V:3 * V]
        for i in range(3):
            r0 = b * 16 + 4 * i
            row = (t_all[r0 + 0:r0 + 1, :] * vx
                   + t_all[r0 + 1:r0 + 2, :] * vy
                   + t_all[r0 + 2:r0 + 3, :] * vz
                   + t_all[r0 + 3:r0 + 4, :]
                   + trans_ref[b, i])               # SMEM scalar -> broadcast
            verts_ref[b:b + 1, i * V:(i + 1) * V] = row


def lbs_fused_pallas(coefs, wstack, vtemp_cm, a_stacked_t, weights_t, trans):
    flops = 2 * B * C * V3 + 2 * (B * 16) * J * V + 8 * B * 3 * V
    bytes_accessed = 4 * (B * C + C * V3 + B * V3 + (B * 16) * J + J * V
                          + B * 3 + 2 * B * V3)
    return pl.pallas_call(
        _lbs_fused_kernel,
        out_shape=(jax.ShapeDtypeStruct((B, V3), jnp.float32),   # v_posed (cm)
                   jax.ShapeDtypeStruct((B, V3), jnp.float32)),  # verts   (cm)
        in_specs=[_VMEM, _VMEM, _VMEM, _VMEM, _VMEM, _SMEM],
        out_specs=(_VMEM, _VMEM),
        compiler_params=pltpu.CompilerParams(
            vmem_limit_bytes=16 * 1024 * 1024),
        cost_estimate=pl.CostEstimate(flops=flops, transcendentals=0,
                                      bytes_accessed=bytes_accessed),
    )(coefs, wstack, vtemp_cm, a_stacked_t, weights_t, trans)


# ----------------------------- JAX glue (tiny / serial) ----------------------
def batch_rodrigues(aa):
    # aa: (N, 3) axis-angle -> (N, 3, 3) rotation matrices
    angle = jnp.sqrt(jnp.sum((aa + 1e-8) ** 2, axis=1, keepdims=True))
    rot_dir = aa / angle
    cos = jnp.cos(angle)[:, None]
    sin = jnp.sin(angle)[:, None]
    rx, ry, rz = jnp.split(rot_dir, 3, axis=1)
    zeros = jnp.zeros_like(rx)
    K = jnp.concatenate([zeros, -rz, ry, rz, zeros, -rx, -ry, rx, zeros],
                        axis=1).reshape(-1, 3, 3)
    ident = jnp.eye(3, dtype=aa.dtype)[None]
    return ident + sin * K + (1.0 - cos) * jnp.matmul(K, K)


def batch_rigid_transform(rot_mats, joints, parents):
    # TODO(synk): sequential 24-step kinematic chain kept in plain JAX (no
    # clean Pallas equivalent for a tiny serial parent-child 4x4 chain).
    Bn, N = rot_mats.shape[0], joints.shape[1]
    joints_e = joints[..., None]                                   # (B,N,3,1)
    rel = jnp.concatenate(
        [joints_e[:, :1], joints_e[:, 1:] - joints_e[:, parents[1:]]], axis=1)
    R = rot_mats.reshape(-1, 3, 3)
    t = rel.reshape(-1, 3, 1)
    Rp = jnp.pad(R, ((0, 0), (0, 1), (0, 0)))
    tp = jnp.pad(t, ((0, 0), (0, 1), (0, 0)), constant_values=1.0)
    tmats = jnp.concatenate([Rp, tp], axis=2).reshape(Bn, N, 4, 4)
    chain = [tmats[:, 0]]
    for i in range(1, N):
        chain.append(jnp.matmul(chain[int(parents[i])], tmats[:, i]))
    transforms = jnp.stack(chain, axis=1)                          # (B,N,4,4)
    posed_joints = transforms[:, :, :3, 3]
    jh = jnp.concatenate(
        [joints_e, jnp.zeros((Bn, N, 1, 1), dtype=joints.dtype)], axis=2)
    init_bone = jnp.matmul(transforms, jh)                         # (B,N,4,1)
    init_bone = jnp.pad(init_bone, ((0, 0), (0, 0), (0, 0), (3, 0)))
    rel_transforms = transforms - init_bone
    return posed_joints, rel_transforms, transforms


# ----------------------------- full forward ----------------------------------
def body_model_forward(params, root_orient, pose_body, pose_hand, betas, trans):
    full_pose = jnp.concatenate([root_orient, pose_body, pose_hand], axis=1)
    rot_mats = batch_rodrigues(full_pose.reshape(-1, 3)).reshape(B, J, 3, 3)
    ident = jnp.eye(3, dtype=jnp.float32)
    pose_feature = (rot_mats[:, 1:] - ident).reshape(B, P)          # (B, 207)

    # joints via the folded regressor: tiny (B,10)x(10,72) op in plain JAX.
    joints = (params["J_template_flat"]
              + betas @ params["J_shapedirs_T"]).reshape(B, J, 3)

    J_transformed, A, abs_A = batch_rigid_transform(rot_mats, joints,
                                                    SMPL_PARENTS)

    # stack relative transforms as (B*16, J) so the kernel does one matmul
    a_stacked_t = jnp.transpose(A.reshape(B, J, 16), (0, 2, 1)).reshape(B * 16, J)
    coefs = jnp.concatenate([betas, pose_feature], axis=1)          # (B, 217)

    v_posed_cm, verts_cm = lbs_fused_pallas(
        coefs, params["wstack"], params["vtemp_cm"], a_stacked_t,
        params["weights_T"], trans)

    # back to (B, V, 3) layout in the wrapper (layout plumbing, not compute)
    verts = jnp.transpose(verts_cm.reshape(B, 3, V), (0, 2, 1))     # + trans in kernel
    v_posed = jnp.transpose(v_posed_cm.reshape(B, 3, V), (0, 2, 1))

    Jtr = J_transformed + trans[:, None, :]
    v_a_pose = v_posed + trans[:, None, :]
    return {
        "v": verts,
        "v_a_pose": v_a_pose,
        "Jtr": Jtr,
        "bone_transforms": A,
        "abs_bone_transforms": abs_A,
        "betas": betas,
        "full_pose": full_pose,
    }


# ----------------------------- pure-JAX reference ----------------------------
def reference_forward(params, root_orient, pose_body, pose_hand, betas, trans):
    # matches the PyTorch lbs() semantics (non-folded, vertex-major layout)
    full_pose = jnp.concatenate([root_orient, pose_body, pose_hand], axis=1)
    rot_mats = batch_rodrigues(full_pose.reshape(-1, 3)).reshape(B, J, 3, 3)
    pose_feature = (rot_mats[:, 1:] - jnp.eye(3, dtype=jnp.float32)).reshape(B, -1)
    v_template = jnp.broadcast_to(params["v_template"][None], (B, V, 3))
    v_shaped = v_template + jnp.einsum("bl,mkl->bmk", betas, params["shapedirs"])
    joints = jnp.einsum("bik,ji->bjk", v_shaped, params["J_regressor"])
    v_posed = v_shaped + jnp.matmul(pose_feature, params["posedirs"]).reshape(B, V, 3)
    J_transformed, A, _ = batch_rigid_transform(rot_mats, joints, SMPL_PARENTS)
    W = jnp.broadcast_to(params["weights"][None], (B, V, J))
    T = jnp.matmul(W, A.reshape(B, J, 16)).reshape(B, V, 4, 4)
    homo = jnp.concatenate([v_posed, jnp.ones((B, V, 1), jnp.float32)], axis=2)
    v_homo = jnp.matmul(T, homo[..., None])
    verts = v_homo[:, :, :3, 0]
    return (verts + trans[:, None, :],
            J_transformed + trans[:, None, :],
            v_posed + trans[:, None, :])


# ----------------------------- param construction ----------------------------
def build_params(key):
    keys = jax.random.split(key, 5)
    v_template = jax.random.normal(keys[0], (V, 3), jnp.float32) * 0.1
    shapedirs = jax.random.normal(keys[1], (V, 3, L), jnp.float32) * 0.01
    # posedirs columns in the original vertex-major layout (col = v*3 + k)
    posedirs = jax.random.normal(keys[2], (P, V3), jnp.float32) * 0.001
    J_regressor = jax.random.uniform(keys[3], (J, V), jnp.float32)
    J_regressor = J_regressor / jnp.sum(J_regressor, axis=1, keepdims=True)
    weights = jax.nn.softmax(jax.random.normal(keys[4], (V, J), jnp.float32),
                             axis=-1)

    # ---- offline precompute: folded / stacked / coordinate-major weights ----
    # coordinate-major column layout: col = k*V + v
    shapedirs_cm_T = jnp.transpose(shapedirs, (2, 1, 0)).reshape(L, V3)  # (L,3V)
    posedirs_cm = jnp.transpose(posedirs.reshape(P, V, 3),
                                (0, 2, 1)).reshape(P, V3)                # (P,3V)
    wstack = jnp.concatenate([shapedirs_cm_T, posedirs_cm], axis=0)      # (217,3V)
    vtemp_cm = jnp.broadcast_to(v_template.T.reshape(1, V3), (B, V3))    # (B,3V)

    # fold J_regressor into the shape blendshapes
    J_template = J_regressor @ v_template                                # (J,3)
    J_shapedirs = jnp.einsum("jv,vkl->jkl", J_regressor, shapedirs)      # (J,3,L)
    J_shapedirs_T = J_shapedirs.reshape(J * 3, L).T                      # (L,J*3)

    return dict(
        # originals (for the reference path)
        v_template=v_template, shapedirs=shapedirs, posedirs=posedirs,
        J_regressor=J_regressor, weights=weights,
        # precomputed kernel operands
        wstack=wstack, vtemp_cm=vtemp_cm, weights_T=weights.T,
        J_template_flat=J_template.reshape(1, J * 3),
        J_shapedirs_T=J_shapedirs_T,
    )


# ----------------------------- main -------------------------------------------
if __name__ == "__main__":
    key = jax.random.PRNGKey(0)
    pkey, ikey = jax.random.split(key)
    params = build_params(pkey)

    ikeys = jax.random.split(ikey, 5)
    # SMPL inputs: root 3 + body 63 + hand 6 = 72 axis-angle
    root_orient = jax.random.normal(ikeys[0], (B, 3), jnp.float32) * 0.1
    pose_body = jax.random.normal(ikeys[1], (B, 63), jnp.float32) * 0.1
    pose_hand = jax.random.normal(ikeys[2], (B, 6), jnp.float32) * 0.1
    betas = jax.random.normal(ikeys[3], (B, L), jnp.float32) * 0.5
    trans = jax.random.normal(ikeys[4], (B, 3), jnp.float32) * 0.1

    out = body_model_forward(params, root_orient, pose_body, pose_hand, betas,
                             trans)
    out = jax.tree_util.tree_map(jax.block_until_ready, out)

    verts_ref, jtr_ref, vap_ref = reference_forward(
        params, root_orient, pose_body, pose_hand, betas, trans)
    np.testing.assert_allclose(np.asarray(out["v"]), np.asarray(verts_ref),
                               rtol=1e-2, atol=1e-2)
    np.testing.assert_allclose(np.asarray(out["Jtr"]), np.asarray(jtr_ref),
                               rtol=1e-2, atol=1e-2)
    np.testing.assert_allclose(np.asarray(out["v_a_pose"]), np.asarray(vap_ref),
                               rtol=1e-2, atol=1e-2)

    print("KERNEL_OK")
</pallas_src>

<mosaic_0001>
module attributes {stable_mosaic.version = 11 : i64} {
  func.func @_lbs_fused_kernel(%arg0: memref<2x217xf32, #tpu.memory_space<vmem>>, %arg1: memref<217x384xf32, #tpu.memory_space<vmem>>, %arg2: memref<2x384xf32, #tpu.memory_space<vmem>>, %arg3: memref<32x24xf32, #tpu.memory_space<vmem>>, %arg4: memref<24x128xf32, #tpu.memory_space<vmem>>, %arg5: memref<2x3xf32, #tpu.memory_space<smem>>, %arg6: memref<2x384xf32, #tpu.memory_space<vmem>>, %arg7: memref<2x384xf32, #tpu.memory_space<vmem>>) attributes {dimension_semantics = [], scalar_prefetch = 0 : i64, scratch_operands = 0 : i64, tpu.core_type = #tpu.core_type<tc>} {
    %c0 = arith.constant 0 : index
    %c0_0 = arith.constant 0 : index
    %0 = vector.load %arg2[%c0, %c0_0] : memref<2x384xf32, #tpu.memory_space<vmem>>, vector<2x384xf32>
    %c0_1 = arith.constant 0 : index
    %c0_2 = arith.constant 0 : index
    %1 = vector.load %arg0[%c0_1, %c0_2] : memref<2x217xf32, #tpu.memory_space<vmem>>, vector<2x217xf32>
    %c0_3 = arith.constant 0 : index
    %c0_4 = arith.constant 0 : index
    %2 = vector.load %arg1[%c0_3, %c0_4] : memref<217x384xf32, #tpu.memory_space<vmem>>, vector<217x384xf32>
    %cst = arith.constant dense<0.000000e+00> : vector<2x384xf32>
    %3 = tpu.matmul %1, %2, %cst {dimension_numbers = #tpu.dot_dimension_numbers<[1], [0], [0], [1], [0, 0, 1, 1], [], []>} : vector<2x217xf32>, vector<217x384xf32>, vector<2x384xf32> -> vector<2x384xf32>
    %4 = arith.addf %0, %3 : vector<2x384xf32>
    %c0_5 = arith.constant 0 : index
    %c0_6 = arith.constant 0 : index
    %5 = vector.load %arg6[%c0_5, %c0_6] : memref<2x384xf32, #tpu.memory_space<vmem>>, vector<2x384xf32>
    tpu.vector_store %arg6[%c0_5, %c0_6], %4 {strides = array<i32>} : memref<2x384xf32, #tpu.memory_space<vmem>>, vector<2x384xf32>,
    %c0_7 = arith.constant 0 : index
    %c0_8 = arith.constant 0 : index
    %6 = vector.load %arg3[%c0_7, %c0_8] : memref<32x24xf32, #tpu.memory_space<vmem>>, vector<32x24xf32>
    %c0_9 = arith.constant 0 : index
    %c0_10 = arith.constant 0 : index
    %7 = vector.load %arg4[%c0_9, %c0_10] : memref<24x128xf32, #tpu.memory_space<vmem>>, vector<24x128xf32>
    %cst_11 = arith.constant dense<0.000000e+00> : vector<32x128xf32>
    %8 = tpu.matmul %6, %7, %cst_11 {dimension_numbers = #tpu.dot_dimension_numbers<[1], [0], [0], [1], [0, 0, 1, 1], [], []>} : vector<32x24xf32>, vector<24x128xf32>, vector<32x128xf32> -> vector<32x128xf32>
    %9 = vector.extract_strided_slice %4 {offsets = [0, 0], sizes = [1, 128], strides = [1, 1]} : vector<2x384xf32> to vector<1x128xf32>
    %10 = vector.extract_strided_slice %4 {offsets = [0, 128], sizes = [1, 128], strides = [1, 1]} : vector<2x384xf32> to vector<1x128xf32>
    %11 = vector.extract_strided_slice %4 {offsets = [0, 256], sizes = [1, 128], strides = [1, 1]} : vector<2x384xf32> to vector<1x128xf32>
    %12 = vector.extract_strided_slice %8 {offsets = [0, 0], sizes = [1, 128], strides = [1, 1]} : vector<32x128xf32> to vector<1x128xf32>
    %13 = arith.mulf %12, %9 : vector<1x128xf32>
    %14 = vector.extract_strided_slice %8 {offsets = [1, 0], sizes = [1, 128], strides = [1, 1]} : vector<32x128xf32> to vector<1x128xf32>
    %15 = arith.mulf %14, %10 : vector<1x128xf32>
    %16 = arith.addf %13, %15 : vector<1x128xf32>
    %17 = vector.extract_strided_slice %8 {offsets = [2, 0], sizes = [1, 128], strides = [1, 1]} : vector<32x128xf32> to vector<1x128xf32>
    %18 = arith.mulf %17, %11 : vector<1x128xf32>
    %19 = arith.addf %16, %18 : vector<1x128xf32>
    %20 = vector.extract_strided_slice %8 {offsets = [3, 0], sizes = [1, 128], strides = [1, 1]} : vector<32x128xf32> to vector<1x128xf32>
    %21 = arith.addf %19, %20 : vector<1x128xf32>
    %c0_12 = arith.constant 0 : index
    %c0_13 = arith.constant 0 : index
    %22 = memref.load %arg5[%c0_12, %c0_13] : memref<2x3xf32, #tpu.memory_space<smem>>
    %23 = vector.broadcast %22 : f32 to vector<1x128xf32>
    %24 = arith.addf %21, %23 : vector<1x128xf32>
    %c0_14 = arith.constant 0 : index
    %c0_15 = arith.constant 0 : index
    %25 = vector.load %arg7[%c0_14, %c0_15] : memref<2x384xf32, #tpu.memory_space<vmem>>, vector<1x128xf32>
    tpu.vector_store %arg7[%c0_14, %c0_15], %24 {strides = array<i32>} : memref<2x384xf32, #tpu.memory_space<vmem>>, vector<1x128xf32>,
    %26 = vector.extract_strided_slice %8 {offsets = [4, 0], sizes = [1, 128], strides = [1, 1]} : vector<32x128xf32> to vector<1x128xf32>
    %27 = arith.mulf %26, %9 : vector<1x128xf32>
    %28 = vector.extract_strided_slice %8 {offsets = [5, 0], sizes = [1, 128], strides = [1, 1]} : vector<32x128xf32> to vector<1x128xf32>
    %29 = arith.mulf %28, %10 : vector<1x128xf32>
    %30 = arith.addf %27, %29 : vector<1x128xf32>
    %31 = vector.extract_strided_slice %8 {offsets = [6, 0], sizes = [1, 128], strides = [1, 1]} : vector<32x128xf32> to vector<1x128xf32>
    %32 = arith.mulf %31, %11 : vector<1x128xf32>
    %33 = arith.addf %30, %32 : vector<1x128xf32>
    %34 = vector.extract_strided_slice %8 {offsets = [7, 0], sizes = [1, 128], strides = [1, 1]} : vector<32x128xf32> to vector<1x128xf32>
    %35 = arith.addf %33, %34 : vector<1x128xf32>
    %c0_16 = arith.constant 0 : index
    %c1 = arith.constant 1 : index
    %36 = memref.load %arg5[%c0_16, %c1] : memref<2x3xf32, #tpu.memory_space<smem>>
    %37 = vector.broadcast %36 : f32 to vector<1x128xf32>
    %38 = arith.addf %35, %37 : vector<1x128xf32>
    %c0_17 = arith.constant 0 : index
    %c128 = arith.constant 128 : index
    %39 = vector.load %arg7[%c0_17, %c128] : memref<2x384xf32, #tpu.memory_space<vmem>>, vector<1x128xf32>
    tpu.vector_store %arg7[%c0_17, %c128], %38 {strides = array<i32>} : memref<2x384xf32, #tpu.memory_space<vmem>>, vector<1x128xf32>,
    %40 = vector.extract_strided_slice %8 {offsets = [8, 0], sizes = [1, 128], strides = [1, 1]} : vector<32x128xf32> to vector<1x128xf32>
    %41 = arith.mulf %40, %9 : vector<1x128xf32>
    %42 = vector.extract_strided_slice %8 {offsets = [9, 0], sizes = [1, 128], strides = [1, 1]} : vector<32x128xf32> to vector<1x128xf32>
    %43 = arith.mulf %42, %10 : vector<1x128xf32>
    %44 = arith.addf %41, %43 : vector<1x128xf32>
    %45 = vector.extract_strided_slice %8 {offsets = [10, 0], sizes = [1, 128], strides = [1, 1]} : vector<32x128xf32> to vector<1x128xf32>
    %46 = arith.mulf %45, %11 : vector<1x128xf32>
    %47 = arith.addf %44, %46 : vector<1x128xf32>
    %48 = vector.extract_strided_slice %8 {offsets = [11, 0], sizes = [1, 128], strides = [1, 1]} : vector<32x128xf32> to vector<1x128xf32>
    %49 = arith.addf %47, %48 : vector<1x128xf32>
    %c0_18 = arith.constant 0 : index
    %c2 = arith.constant 2 : index
    %50 = memref.load %arg5[%c0_18, %c2] : memref<2x3xf32, #tpu.memory_space<smem>>
    %51 = vector.broadcast %50 : f32 to vector<1x128xf32>
    %52 = arith.addf %49, %51 : vector<1x128xf32>
    %c0_19 = arith.constant 0 : index
    %c256 = arith.constant 256 : index
    %53 = vector.load %arg7[%c0_19, %c256] : memref<2x384xf32, #tpu.memory_space<vmem>>, vector<1x128xf32>
    tpu.vector_store %arg7[%c0_19, %c256], %52 {strides = array<i32>} : memref<2x384xf32, #tpu.memory_space<vmem>>, vector<1x128xf32>,
    %54 = vector.extract_strided_slice %4 {offsets = [1, 0], sizes = [1, 128], strides = [1, 1]} : vector<2x384xf32> to vector<1x128xf32>
    %55 = vector.extract_strided_slice %4 {offsets = [1, 128], sizes = [1, 128], strides = [1, 1]} : vector<2x384xf32> to vector<1x128xf32>
    %56 = vector.extract_strided_slice %4 {offsets = [1, 256], sizes = [1, 128], strides = [1, 1]} : vector<2x384xf32> to vector<1x128xf32>
    %57 = vector.extract_strided_slice %8 {offsets = [16, 0], sizes = [1, 128], strides = [1, 1]} : vector<32x128xf32> to vector<1x128xf32>
    %58 = arith.mulf %57, %54 : vector<1x128xf32>
    %59 = vector.extract_strided_slice %8 {offsets = [17, 0], sizes = [1, 128], strides = [1, 1]} : vector<32x128xf32> to vector<1x128xf32>
    %60 = arith.mulf %59, %55 : vector<1x128xf32>
    %61 = arith.addf %58, %60 : vector<1x128xf32>
    %62 = vector.extract_strided_slice %8 {offsets = [18, 0], sizes = [1, 128], strides = [1, 1]} : vector<32x128xf32> to vector<1x128xf32>
    %63 = arith.mulf %62, %56 : vector<1x128xf32>
    %64 = arith.addf %61, %63 : vector<1x128xf32>
    %65 = vector.extract_strided_slice %8 {offsets = [19, 0], sizes = [1, 128], strides = [1, 1]} : vector<32x128xf32> to vector<1x128xf32>
    %66 = arith.addf %64, %65 : vector<1x128xf32>
    %c1_20 = arith.constant 1 : index
    %c0_21 = arith.constant 0 : index
    %67 = memref.load %arg5[%c1_20, %c0_21] : memref<2x3xf32, #tpu.memory_space<smem>>
    %68 = vector.broadcast %67 : f32 to vector<1x128xf32>
    %69 = arith.addf %66, %68 : vector<1x128xf32>
    %c1_22 = arith.constant 1 : index
    %c0_23 = arith.constant 0 : index
    %70 = vector.load %arg7[%c1_22, %c0_23] : memref<2x384xf32, #tpu.memory_space<vmem>>, vector<1x128xf32>
    tpu.vector_store %arg7[%c1_22, %c0_23], %69 {strides = array<i32>} : memref<2x384xf32, #tpu.memory_space<vmem>>, vector<1x128xf32>,
    %71 = vector.extract_strided_slice %8 {offsets = [20, 0], sizes = [1, 128], strides = [1, 1]} : vector<32x128xf32> to vector<1x128xf32>
    %72 = arith.mulf %71, %54 : vector<1x128xf32>
    %73 = vector.extract_strided_slice %8 {offsets = [21, 0], sizes = [1, 128], strides = [1, 1]} : vector<32x128xf32> to vector<1x128xf32>
    %74 = arith.mulf %73, %55 : vector<1x128xf32>
    %75 = arith.addf %72, %74 : vector<1x128xf32>
    %76 = vector.extract_strided_slice %8 {offsets = [22, 0], sizes = [1, 128], strides = [1, 1]} : vector<32x128xf32> to vector<1x128xf32>
    %77 = arith.mulf %76, %56 : vector<1x128xf32>
    %78 = arith.addf %75, %77 : vector<1x128xf32>
    %79 = vector.extract_strided_slice %8 {offsets = [23, 0], sizes = [1, 128], strides = [1, 1]} : vector<32x128xf32> to vector<1x128xf32>
    %80 = arith.addf %78, %79 : vector<1x128xf32>
    %c1_24 = arith.constant 1 : index
    %c1_25 = arith.constant 1 : index
    %81 = memref.load %arg5[%c1_24, %c1_25] : memref<2x3xf32, #tpu.memory_space<smem>>
    %82 = vector.broadcast %81 : f32 to vector<1x128xf32>
    %83 = arith.addf %80, %82 : vector<1x128xf32>
    %c1_26 = arith.constant 1 : index
    %c128_27 = arith.constant 128 : index
    %84 = vector.load %arg7[%c1_26, %c128_27] : memref<2x384xf32, #tpu.memory_space<vmem>>, vector<1x128xf32>
    tpu.vector_store %arg7[%c1_26, %c128_27], %83 {strides = array<i32>} : memref<2x384xf32, #tpu.memory_space<vmem>>, vector<1x128xf32>,
    %85 = vector.extract_strided_slice %8 {offsets = [24, 0], sizes = [1, 128], strides = [1, 1]} : vector<32x128xf32> to vector<1x128xf32>
    %86 = arith.mulf %85, %54 : vector<1x128xf32>
    %87 = vector.extract_strided_slice %8 {offsets = [25, 0], sizes = [1, 128], strides = [1, 1]} : vector<32x128xf32> to vector<1x128xf32>
    %88 = arith.mulf %87, %55 : vector<1x128xf32>
    %89 = arith.addf %86, %88 : vector<1x128xf32>
    %90 = vector.extract_strided_slice %8 {offsets = [26, 0], sizes = [1, 128], strides = [1, 1]} : vector<32x128xf32> to vector<1x128xf32>
    %91 = arith.mulf %90, %56 : vector<1x128xf32>
    %92 = arith.addf %89, %91 : vector<1x128xf32>
    %93 = vector.extract_strided_slice %8 {offsets = [27, 0], sizes = [1, 128], strides = [1, 1]} : vector<32x128xf32> to vector<1x128xf32>
    %94 = arith.addf %92, %93 : vector<1x128xf32>
    %c1_28 = arith.constant 1 : index
    %c2_29 = arith.constant 2 : index
    %95 = memref.load %arg5[%c1_28, %c2_29] : memref<2x3xf32, #tpu.memory_space<smem>>
    %96 = vector.broadcast %95 : f32 to vector<1x128xf32>
    %97 = arith.addf %94, %96 : vector<1x128xf32>
    %c1_30 = arith.constant 1 : index
    %c256_31 = arith.constant 256 : index
    %98 = vector.load %arg7[%c1_30, %c256_31] : memref<2x384xf32, #tpu.memory_space<vmem>>, vector<1x128xf32>
    tpu.vector_store %arg7[%c1_30, %c256_31], %97 {strides = array<i32>} : memref<2x384xf32, #tpu.memory_space<vmem>>, vector<1x128xf32>,
    return
  }
}

</mosaic_0001>

<bundles_post_ra>
// kernel: tpu_custom_call.1
= control target key start
LH: loop header
LB: loop body
LE: loop exit
PB: predicated region body
PF: predicated region fallthrough
CT: control target
= control target key end

     0   :  { %13 = vsyncpa [#allocation3], 0  ;;  %s1024_s0 = inlined_call_operand.vmem [shape: f32[2,217], index: 0, kind: input, shape index: {}]   ;;  %s1025_s1 = inlined_call_operand.hbm [shape: f32[217,384], index: 1, kind: input, shape index: {}]   ;;  %s1026_s2 = inlined_call_operand.vmem [shape: f32[2,384], index: 2, kind: input, shape index: {}]   ;;  %s1027_s3 = inlined_call_operand.vmem [shape: f32[32,24], index: 3, kind: input, shape index: {}]   ;;  %s1028_s4 = inlined_call_operand.vmem [shape: f32[24,128], index: 4, kind: input, shape index: {}]   ;;  %s1029_s5 = inlined_call_operand.vmem [shape: f32[2,3], index: 5, kind: input, shape index: {}]   ;;  %s1030_s6 = inlined_call_operand.hbm [shape: f32[2,384], index: 6, kind: output, shape index: {0}]   ;;  %s1031_s7 = inlined_call_operand.hbm [shape: f32[2,384], index: 7, kind: output, shape index: {1}]  }
   0x1   :  { %14 = vsyncpa [#allocation5], 0 }
   0x2   :  { %15 = vsyncpa [#allocation4], 0 }
   0x3   :  { %16 = vsyncpa [#allocation9], 0  ;;  %s840_s24 = smov [#allocation2]   ;;  %s43_s28 = sshll.u32 %s1029_s5, 4  ;;  %s44_s28 = int_to_ptr.vmem [resolvable:$true] %s43_s28 }
   0x4   :  { %s24_s25 = sshll.u32 %s840_s24, 4  ;;  %s754_s8 = scalar_lea.hbm %s1025_s1, 10752  ;;  %s25_s25 = int_to_ptr.vmem [resolvable:$true] %s24_s25 }
   0x5   :  { %p755_p0 = scmp.ne.s32.totalorder %s1025_s1, %s754_s8  ;;  %p758_p1 = scmp.lt.u32.totalorder %s754_s8, %s1025_s1 }
   0x7   :  { %p760_p2 = pnand %p758_p1, %p755_p0 }
   0x9   :  { %763 = shalt.err (!%p760_p2)
}
   0xa   :  { %s764_s13 = scalar_lea.vmem %s25_s25, 10752  ;;  %p769_p4 = scmp.lt.s32.totalorder %s25_s25, %s25_s25 }
   0xb   :  { %p765_p3 = scmp.ne.s32.totalorder %s25_s25, %s764_s13  ;;  %p770_p5 = scmp.lt.s32.totalorder %s764_s13, %s764_s13 }
   0xd   :  { %p771_p6 = por %p770_p5, %p769_p4 }
   0xf   :  { %p772_p7 = pnand %p771_p6, %p765_p3 }
  0x11   :  { %775 = shalt.err (!%p772_p7)
}
  0x12   :  { %s841_s5 = smov 384   ;;  %s842_s14 = smov 24  }
  0x13   :  { %30 = dma.hbm_to_vmem [thread:$0]  %s1025_s1, 10752, %s25_s25, [#allocation3], %s841_s5, %s841_s5, %s842_s14  }
  0x14   :  { %s776_s17 = scalar_lea.vmem %s44_s28, 32  ;;  %p781_p9 = scmp.lt.s32.totalorder %s44_s28, %s44_s28 }
  0x15   :  { %p777_p8 = scmp.ne.s32.totalorder %s44_s28, %s776_s17  ;;  %p782_p10 = scmp.lt.s32.totalorder %s776_s17, %s776_s17 }
  0x17   :  { %p783_p11 = por %p782_p10, %p781_p9 }
  0x19   :  { %p784_p12 = pnand %p783_p11, %p777_p8 }
  0x1b   :  { %787 = shalt.err (!%p784_p12)
}
  0x1c   :  { %s843_s18 = smov [#allocation6]  }
  0x1d   :  { %46 = dma.vmem_to_smem %s44_s28, 32, %s843_s18, [#allocation5]  }
  0x1e   :  { %832 = dma.done.wait [#allocation3], 10752  }
  0x1f   :  { %833 = vsyncadd [#allocation3], 4294956544 }
  0x20   :  { %834 = dma.done.wait [#allocation5], 32  }
  0x21   :  { %835 = vsyncadd [#allocation5], 4294967264 }
  0x22   :  { %53 = sfence }
  0x23   :  { %v57_v0 = vld [vmem:[#allocation2 + $0x8] sm:$0xff]  ;;  %v60_v1 = vld [vmem:[#allocation2 + $0x20] sm:$0xff]  ;;  %v59_v4 = vld [vmem:[#allocation2 + $0x18] sm:$0xff]  ;;  %v844_v5 = vmov 0.0|0.0   ;;  %vm150_vm0 = vcmask 728064   ;;  %vm153_vm1 = vcmask 1040384  }
  0x24   :  { %v56_v2 = vld [vmem:[#allocation2] sm:$0xff]  ;;  %v636_v3 = vpack.c.bf16 %v60_v1, %v57_v0  ;;  %694 = vmatprep.subr.bf16.mxu1 %v844_v5  ;;  %v58_v6 = vld [vmem:[#allocation2 + $0x10] sm:$0xff]  ;;  %v61_v7 = vld [vmem:[#allocation2 + $0x28] sm:$0xff]  ;;  %vm845_vm2 = vmmov 1   ;;  %vm333_vm4 = vcmask 195584   ;;  %s948_s9 = sld [smem:[#allocation6 + $0x2]] }
  0x25   :  { %v638_v8 = vpack.c.bf16 %v59_v4, %v56_v2  ;;  %v695_v9 = vpack.c.bf16 %v61_v7, %v58_v6  ;;  %v63_v10 = vld [vmem:[#allocation2 + $0x38] sm:$0xff]  ;;  %v66_v11 = vld [vmem:[#allocation2 + $0x50] sm:$0xff]  ;;  %v65_v14 = vld [vmem:[#allocation2 + $0x48] sm:$0xff]  ;;  %s950_s10 = sld [smem:[#allocation6]]  ;;  %s952_s11 = sld [smem:[#allocation6 + $0x1]] }
  0x26   :  { %v62_v12 = vld [vmem:[#allocation2 + $0x30] sm:$0xff]  ;;  %637 = vmatprep.subr.bf16.mxu0 %v636_v3  ;;  %v640_v13 = vpack.c.bf16 %v66_v11, %v63_v10  ;;  %v64_v15 = vld [vmem:[#allocation2 + $0x40] sm:$0xff]  ;;  %v67_v16 = vld [vmem:[#allocation2 + $0x58] sm:$0xff]  ;;  %s847_s13 = smov [#allocation7]   ;;  %s961_s14 = sld [smem:[#allocation6 + $0x80]] }
  0x27   :  { %639 = vmatpush1.bf16.msra.mxu0 %v638_v8  ;;  %696 = vmatpush1.bf16.msra.mxu1 %v695_v9  ;;  %v642_v17 = vpack.c.bf16 %v65_v14, %v62_v12  ;;  %v698_v18 = vpack.c.bf16 %v67_v16, %v64_v15  ;;  %v69_v19 = vld [vmem:[#allocation2 + $0x68] sm:$0xff]  ;;  %v72_v20 = vld [vmem:[#allocation2 + $0x80] sm:$0xff]  ;;  %v71_v23 = vld [vmem:[#allocation2 + $0x78] sm:$0xff]  ;;  %s576_s5 = sshll.u32 %s847_s13, 4  ;;  %s577_s5 = int_to_ptr.vmem [resolvable:$true] %s576_s5 }
  0x28   :  { %v68_v21 = vld [vmem:[#allocation2 + $0x60] sm:$0xff]  ;;  %641 = vmatprep.subr.bf16.mxu0 %v640_v13  ;;  %697 = vmatprep.subr.bf16.mxu1 %v844_v5  ;;  %v644_v22 = vpack.c.bf16 %v72_v20, %v69_v19  ;;  %v70_v24 = vld [vmem:[#allocation2 + $0x70] sm:$0xff]  ;;  %v73_v25 = vld [vmem:[#allocation2 + $0x88] sm:$0xff]  ;;  %p793_p0 = scmp.lt.s32.totalorder %s577_s5, %s577_s5 }
  0x29   :  { %v75_v26 = vld [vmem:[#allocation2 + $0x98] sm:$0xff]  ;;  %v78_v27 = vld [vmem:[#allocation2 + $0xb0] sm:$0xff]  ;;  %v646_v28 = vpack.c.bf16 %v71_v23, %v68_v21  ;;  %v701_v29 = vpack.c.bf16 %v73_v25, %v70_v24  ;;  %v77_v32 = vld [vmem:[#allocation2 + $0xa8] sm:$0xff] }
  0x2a   :  { %v74_v30 = vld [vmem:[#allocation2 + $0x90] sm:$0xff]  ;;  %v648_v31 = vpack.c.bf16 %v78_v27, %v75_v26  ;;  %v76_v33 = vld [vmem:[#allocation2 + $0xa0] sm:$0xff]  ;;  %v79_v34 = vld [vmem:[#allocation2 + $0xb8] sm:$0xff] }
  0x2b   :  { %643 = vmatpush1.bf16.msra.mxu0 %v642_v17  ;;  %699 = vmatpush1.bf16.msra.mxu1 %v698_v18  ;;  %v81_v35 = vld [vmem:[#allocation2 + $0xc8] sm:$0xff]  ;;  %v84_v36 = vld [vmem:[#allocation2 + $0xe0] sm:$0xff]  ;;  %v650_v37 = vpack.c.bf16 %v77_v32, %v74_v30  ;;  %v704_v38 = vpack.c.bf16 %v79_v34, %v76_v33  ;;  %v83_v41 = vld [vmem:[#allocation2 + $0xd8] sm:$0xff] }
  0x2c   :  { %645 = vmatprep.subr.bf16.mxu0 %v644_v22  ;;  %700 = vmatprep.subr.bf16.mxu1 %v844_v5  ;;  %v80_v39 = vld [vmem:[#allocation2 + $0xc0] sm:$0xff]  ;;  %v652_v40 = vpack.c.bf16 %v84_v36, %v81_v35  ;;  %v82_v42 = vld [vmem:[#allocation2 + $0xd0] sm:$0xff]  ;;  %v85_v43 = vld [vmem:[#allocation2 + $0xe8] sm:$0xff] }
  0x2d   :  { %v87_v44 = vld [vmem:[#allocation2 + $0xf8] sm:$0xff]  ;;  %v90_v45 = vld [vmem:[#allocation2 + $0x110] sm:$0xff]  ;;  %v654_v46 = vpack.c.bf16 %v83_v41, %v80_v39  ;;  %v707_v47 = vpack.c.bf16 %v85_v43, %v82_v42  ;;  %v89_v50 = vld [vmem:[#allocation2 + $0x108] sm:$0xff] }
  0x2e   :  { %v86_v48 = vld [vmem:[#allocation2 + $0xf0] sm:$0xff]  ;;  %v656_v49 = vpack.c.bf16 %v90_v45, %v87_v44  ;;  %v88_v51 = vld [vmem:[#allocation2 + $0x100] sm:$0xff]  ;;  %v91_v52 = vld [vmem:[#allocation2 + $0x118] sm:$0xff] }
  0x2f   :  { %647 = vmatpush1.bf16.msra.mxu0 %v646_v28  ;;  %702 = vmatpush1.bf16.msra.mxu1 %v701_v29  ;;  %v93_v53 = vld [vmem:[#allocation2 + $0x128] sm:$0xff]  ;;  %v96_v54 = vld [vmem:[#allocation2 + $0x140] sm:$0xff]  ;;  %v658_v55 = vpack.c.bf16 %v89_v50, %v86_v48  ;;  %v710_v56 = vpack.c.bf16 %v91_v52, %v88_v51  ;;  %v95_v59 = vld [vmem:[#allocation2 + $0x138] sm:$0xff] }
  0x30   :  { %649 = vmatprep.subr.bf16.mxu0 %v648_v31  ;;  %703 = vmatprep.subr.bf16.mxu1 %v844_v5  ;;  %v92_v57 = vld [vmem:[#allocation2 + $0x120] sm:$0xff]  ;;  %v660_v58 = vpack.c.bf16 %v96_v54, %v93_v53  ;;  %v94_v60 = vld [vmem:[#allocation2 + $0x130] sm:$0xff]  ;;  %v97_v61 = vld [vmem:[#allocation2 + $0x148] sm:$0xff] }
  0x31   :  { %v99_v62 = vld [vmem:[#allocation2 + $0x158] sm:$0xff]  ;;  %v102_v63 = vld [vmem:[#allocation2 + $0x170] sm:$0xff]  ;;  %v662_v0 = vpack.c.bf16 %v95_v59, %v92_v57  ;;  %v713_v1 = vpack.c.bf16 %v97_v61, %v94_v60  ;;  %v101_v4 = vld [vmem:[#allocation2 + $0x168] sm:$0xff] }
  0x32   :  { %v98_v2 = vld [vmem:[#allocation2 + $0x150] sm:$0xff]  ;;  %v664_v3 = vpack.c.bf16 %v102_v63, %v99_v62  ;;  %v100_v6 = vld [vmem:[#allocation2 + $0x160] sm:$0xff]  ;;  %v103_v7 = vld [vmem:[#allocation2 + $0x178] sm:$0xff] }
  0x33   :  { %651 = vmatpush1.bf16.msra.mxu0 %v650_v37  ;;  %705 = vmatpush1.bf16.msra.mxu1 %v704_v38  ;;  %v105_v8 = vld [vmem:[#allocation2 + $0x188] sm:$0xff]  ;;  %v108_v9 = vld [vmem:[#allocation2 + $0x1a0] sm:$0xff]  ;;  %v666_v10 = vpack.c.bf16 %v101_v4, %v98_v2  ;;  %v716_v11 = vpack.c.bf16 %v103_v7, %v100_v6  ;;  %v107_v15 = vld [vmem:[#allocation2 + $0x198] sm:$0xff] }
  0x34   :  { %653 = vmatprep.subr.bf16.mxu0 %v652_v40  ;;  %706 = vmatprep.subr.bf16.mxu1 %v844_v5  ;;  %v104_v12 = vld [vmem:[#allocation2 + $0x180] sm:$0xff]  ;;  %v668_v14 = vpack.c.bf16 %v108_v9, %v105_v8  ;;  %v106_v16 = vld [vmem:[#allocation2 + $0x190] sm:$0xff]  ;;  %v109_v17 = vld [vmem:[#allocation2 + $0x1a8] sm:$0xff] }
  0x35   :  { %v914_v13 = vld.sshfl [vmem:[%s1024_s0] sm:$0x33 pattern:$0x76325410]  ;;  %v111_v19 = vld [vmem:[#allocation2 + $0x1b8] sm:$0xff]  ;;  %v114_v20 = vld [vmem:[#allocation2 + $0x1d0] sm:$0xff]  ;;  %v670_v21 = vpack.c.bf16 %v107_v15, %v104_v12  ;;  %v719_v22 = vpack.c.bf16 %v109_v17, %v106_v16  ;;  %v311_v12 = vlaneseq }
  0x36   :  { %v148_v18 = vcombine.high %v914_v13, %v914_v13  ;;  %v110_v23 = vld [vmem:[#allocation2 + $0x1b0] sm:$0xff]  ;;  %v672_v24 = vpack.c.bf16 %v114_v20, %v111_v19  ;;  %v113_v25 = vld [vmem:[#allocation2 + $0x1c8] sm:$0xff]  ;;  %v112_v26 = vld [vmem:[#allocation2 + $0x1c0] sm:$0xff] }
  0x37   :  { %655 = vmatpush1.bf16.msra.mxu0 %v654_v46  ;;  %708 = vmatpush1.bf16.msra.mxu1 %v707_v47  ;;  %v115_v27 = vld [vmem:[#allocation2 + $0x1d8] sm:$0xff]  ;;  %v117_v28 = vld [vmem:[#allocation2 + $0x1e8] sm:$0xff]  ;;  %v120_v29 = vld [vmem:[#allocation2 + $0x200] sm:$0xff]  ;;  %v674_v30 = vpack.c.bf16 %v113_v25, %v110_v23 }
  0x38   :  { %657 = vmatprep.subr.bf16.mxu0 %v656_v49  ;;  %709 = vmatprep.subr.bf16.mxu1 %v844_v5  ;;  %v722_v31 = vpack.c.bf16 %v115_v27, %v112_v26  ;;  %v116_v32 = vld [vmem:[#allocation2 + $0x1e0] sm:$0xff]  ;;  %v676_v33 = vpack.c.bf16 %v120_v29, %v117_v28  ;;  %v119_v34 = vld [vmem:[#allocation2 + $0x1f8] sm:$0xff]  ;;  %v118_v35 = vld [vmem:[#allocation2 + $0x1f0] sm:$0xff] }
  0x39   :  { %603 = vmatprep.mubr.msk.f32.mxu0 %vm150_vm0, %v148_v18  ;;  %605 = vmatprep.mubr.msk.f32.mxu1 %vm150_vm0, %v148_v18  ;;  %v121_v36 = vld [vmem:[#allocation2 + $0x208] sm:$0xff]  ;;  %v123_v37 = vld [vmem:[#allocation2 + $0x218] sm:$0xff]  ;;  %v126_v38 = vld [vmem:[#allocation2 + $0x230] sm:$0xff]  ;;  %v678_v39 = vpack.c.bf16 %v119_v34, %v116_v32 }
  0x3a   :  { %v725_v40 = vpack.c.bf16 %v121_v36, %v118_v35  ;;  %v122_v41 = vld [vmem:[#allocation2 + $0x210] sm:$0xff]  ;;  %v680_v42 = vpack.c.bf16 %v126_v38, %v123_v37  ;;  %v125_v43 = vld [vmem:[#allocation2 + $0x228] sm:$0xff]  ;;  %v124_v44 = vld [vmem:[#allocation2 + $0x220] sm:$0xff]  ;;  %v500_v36 = vstv %s948_s9  ;;  %v458_v37 = vstv %s950_s10 }
  0x3b   :  { %659 = vmatpush1.bf16.msra.mxu0 %v658_v55  ;;  %711 = vmatpush1.bf16.msra.mxu1 %v710_v56  ;;  %v127_v45 = vld [vmem:[#allocation2 + $0x238] sm:$0xff]  ;;  %v129_v46 = vld [vmem:[#allocation2 + $0x248] sm:$0xff]  ;;  %v132_v47 = vld [vmem:[#allocation2 + $0x260] sm:$0xff]  ;;  %v682_v48 = vpack.c.bf16 %v125_v43, %v122_v41  ;;  %v471_v38 = vstv %s952_s11 }
  0x3c   :  { %661 = vmatprep.subr.bf16.mxu0 %v660_v58  ;;  %712 = vmatprep.subr.bf16.mxu1 %v844_v5  ;;  %v728_v49 = vpack.c.bf16 %v127_v45, %v124_v44  ;;  %v128_v50 = vld [vmem:[#allocation2 + $0x240] sm:$0xff]  ;;  %v684_v51 = vpack.c.bf16 %v132_v47, %v129_v46  ;;  %v131_v52 = vld [vmem:[#allocation2 + $0x258] sm:$0xff]  ;;  %v130_v53 = vld [vmem:[#allocation2 + $0x250] sm:$0xff] }
  0x3d   :  { %v133_v54 = vld [vmem:[#allocation2 + $0x268] sm:$0xff]  ;;  %v135_v55 = vld [vmem:[#allocation2 + $0x278] sm:$0xff]  ;;  %v138_v56 = vld [vmem:[#allocation2 + $0x290] sm:$0x1]  ;;  %v686_v57 = vpack.c.bf16 %v131_v52, %v128_v50 }
  0x3e   :  { %v731_v58 = vpack.c.bf16 %v133_v54, %v130_v53  ;;  %v134_v59 = vld [vmem:[#allocation2 + $0x270] sm:$0xff]  ;;  %v688_v60 = vpack.c.bf16 %v138_v56, %v135_v55  ;;  %v137_v61 = vld [vmem:[#allocation2 + $0x288] sm:$0x1]  ;;  %v136_v62 = vld [vmem:[#allocation2 + $0x280] sm:$0xff] }
  0x3f   :  { %663 = vmatpush1.bf16.msra.mxu0 %v662_v0  ;;  %714 = vmatpush1.bf16.msra.mxu1 %v713_v1  ;;  %v139_v63 = vld [vmem:[#allocation2 + $0x298] sm:$0x1]  ;;  %vm689_vm3 = vmpackc.low %vm153_vm1, %vm845_vm2  ;;  %v330_v0 = vld [vmem:[%s1028_s4] sm:$0xff]  ;;  %v691_v2 = vpack.c.bf16 %v137_v61, %v134_v59 }
  0x40   :  { %665 = vmatprep.subr.bf16.mxu0 %v664_v3  ;;  %715 = vmatprep.subr.bf16.mxu1 %v844_v5  ;;  %v331_v1 = vld [vmem:[%s1028_s4 + $0x8] sm:$0xff]  ;;  %v734_v3 = vpack.c.bf16 %v139_v63, %v136_v62  ;;  %v332_v6 = vld [vmem:[%s1028_s4 + $0x10] sm:$0xff]  ;;  %v326_v7 = vld [vmem:[%s1027_s3] sm:$0xff] }
  0x41   :  { %v737_v4 = vpack.c.bf16 %v331_v1, %v330_v0  ;;  %v327_v8 = vld [vmem:[%s1027_s3 + $0x8] sm:$0xff]  ;;  %v329_v9 = vld [vmem:[%s1027_s3 + $0x18] sm:$0xff]  ;;  %v54_v23 = vld [vmem:[%s1026_s2] sm:$0x3f]  ;;  %s788_s2 = scalar_lea.vmem %s577_s5, 96 }
  0x42   :  { %p789_p13 = scmp.ne.s32.totalorder %s577_s5, %s788_s2  ;;  %p794_p1 = scmp.lt.s32.totalorder %s788_s2, %s788_s2 }
  0x43   :  { %667 = vmatpush1.bf16.msra.mxu0 %v666_v10  ;;  %717 = vmatpush1.bf16.msra.mxu1 %v716_v11  ;;  %v846_v10 = vmov 1983009808  }
  0x44   :  { %669 = vmatprep.subr.bf16.mxu0 %v668_v14  ;;  %718 = vmatprep.subr.bf16.mxu1 %v844_v5  ;;  %v309_v11 = vunpack.c.l.s4 %v846_v10  ;;  %v312_v14 = vshrl.u32 %v311_v12, 7  ;;  %p795_p2 = por %p794_p1, %p793_p0 }
  0x46   :  { %v435_v26 = vsub.s32 2, %v312_v14  ;;  %v445_v27 = vsub.s32 4, %v312_v14  ;;  %v505_v32 = vsub.s32 1, %v312_v14  ;;  %v521_v34 = vsub.s32 5, %v312_v14  ;;  %p796_p3 = pnand %p795_p2, %p789_p13 }
  0x47   :  { %671 = vmatpush1.bf16.msra.mxu0 %v670_v21  ;;  %720 = vmatpush1.bf16.msra.mxu1 %v719_v22 }
  0x48   :  { %673 = vmatprep.subr.bf16.mxu0 %v672_v24  ;;  %721 = vmatprep.subr.bf16.mxu1 %v844_v5 }
  0x4b   :  { %675 = vmatpush1.bf16.msra.mxu0 %v674_v30  ;;  %723 = vmatpush1.bf16.msra.mxu1 %v722_v31  ;;  %v463_v30 = vsub.s32 0, %v312_v14 }
  0x4c   :  { %677 = vmatprep.subr.bf16.mxu0 %v676_v33  ;;  %724 = vmatprep.subr.bf16.mxu1 %v844_v5  ;;  %v511_v33 = vsub.s32 3, %v312_v14 }
  0x4f   :  { %679 = vmatpush1.bf16.msra.mxu0 %v678_v39  ;;  %726 = vmatpush1.bf16.msra.mxu1 %v725_v40 }
  0x50   :  { %681 = vmatprep.subr.bf16.mxu0 %v680_v42  ;;  %727 = vmatprep.subr.bf16.mxu1 %v844_v5 }
  0x53   :  { %683 = vmatpush1.bf16.msra.mxu0 %v682_v48  ;;  %729 = vmatpush1.bf16.msra.mxu1 %v728_v49 }
  0x54   :  { %685 = vmatprep.subr.bf16.mxu0 %v684_v51  ;;  %730 = vmatprep.subr.bf16.mxu1 %v844_v5 }
  0x57   :  { %687 = vmatpush1.bf16.msra.mxu0 %v686_v57  ;;  %732 = vmatpush1.bf16.msra.mxu1 %v731_v58 }
  0x58   :  { %690 = vmatprep.subr.msk.bf16.mxu0 %vm689_vm3, %v688_v60  ;;  %733 = vmatprep.subr.bf16.mxu1 %v844_v5  ;;  %v328_v5 = vld [vmem:[%s1027_s3 + $0x10] sm:$0xff] }
  0x5b   :  { %693 = vmatpush1.bf16.msk.msra.mxu0 %vm689_vm3, %v691_v2  ;;  %736 = vmatpush1.bf16.msk.msra.mxu1 %vm689_vm3, %v734_v3 }
  0x5c   :  { %738 = vmatprep.subr.bf16.mxu0 %v737_v4  ;;  %741 = vmatprep.subr.bf16.mxu1 %v737_v4 }
  0x5e   :  { %228 = vmatmul.mubr.f32.vlgmr.msra.gmra.mrb[0].mxu0 %v914_v13  ;;  %299 = vmatmul.mubr.f32.vlgmr.msra.gmra.mrb[0].mxu1 %v914_v13  ;;  %v310_v13 = vunpack.c.0.s8 %v309_v11 }
  0x5f   :  { %740 = vmatpush3.bf16.msra.mxu0 %v737_v4  ;;  %743 = vmatpush3.bf16.msra.mxu1 %v737_v4 }
  0x60   :  { %628 = vmatprep.subr.mxu0 %v332_v6  ;;  %742 = vmatprep.subr.mxu1 %v332_v6  ;;  %v313_v15 = vsub.s32 %v310_v13, %v312_v14 }
  0x61   :  { %630 = vmatprep.mubr.msk.f32.mxu0 %vm333_vm4, %v326_v7  ;;  %633 = vmatprep.mubr.msk.f32.mxu1 %vm333_vm4, %v328_v5 }
  0x63   :  { %629 = vmatpush3.msra.mxu0 %v332_v6  ;;  %744 = vmatpush3.msra.mxu1 %v332_v6 }
  0x64   :  { %631 = vmatmul.mubr.msk.f32.vlgmr.msra.gmra.mrb[2].mxu0 %vm333_vm4, %v327_v8  ;;  %634 = vmatmul.mubr.msk.f32.vlgmr.msra.gmra.mrb[2].mxu1 %vm333_vm4, %v329_v9 }
 0x131   :  { %v229_v16 = vpop.f32.mrb[0].mxu0  ;;  %v300_v17 = vpop.f32.mrb[0].mxu1 }
 0x132   :  { %v231_v18 = vpop.f32.mrb[1].mxu0  ;;  %v302_v19 = vpop.f32.mrb[1].mxu1  ;;  %v321_v21 = vrot.slane %v300_v17, %v313_v15 }
 0x133   :  { %v307_v20 = vcombine.low %v229_v16, %v231_v18 }
 0x135   :  { %v314_v22 = vrot.slane %v307_v20, %v313_v15 }
 0x137   :  { %v322_v24 = vcombine.low %v314_v22, %v321_v21  ;;  %v957_v25 = vpop.f32.mrb[2].mxu0  ;;  %v959_v28 = vpop.f32.mrb[2].mxu1 }
 0x138   :  { %v963_v29 = vpop.f32.mrb[3].mxu0  ;;  %v965_v31 = vpop.f32.mrb[3].mxu1 }
 0x139   :  { %v324_v35 = vadd.f32 %v322_v24, %v54_v23 }
 0x13b   :  { %325 = vst [vmem:[#allocation7] sm:$0x3f] %v324_v35  ;;  %v436_v39 = vrot.slane %v324_v35, %v435_v26  ;;  %v446_v40 = vrot.slane %v324_v35, %v445_v27  ;;  %v484_v41 = vmul.f32 %v957_v25, %v324_v35  ;;  %v431_v42 = vmul.f32 %v963_v29, %v324_v35 }
 0x13c   :  { %v464_v43 = vrot.slane %v324_v35, %v463_v30  ;;  %v506_v44 = vrot.slane %v324_v35, %v505_v32  ;;  %v512_v45 = vrot.slane %v324_v35, %v511_v33  ;;  %v522_v46 = vrot.slane %v324_v35, %v521_v34 }
 0x13d   :  { %799 = shalt.err (!%p796_p3)
}
 0x13e   :  { %s800_s17 = scalar_lea.hbm %s1030_s6, 96 }
 0x13f   :  { %p801_p4 = scmp.ne.s32.totalorder %s1030_s6, %s800_s17  ;;  %p804_p5 = scmp.lt.u32.totalorder %s800_s17, %s1030_s6 }
 0x141   :  { %p806_p6 = pnand %p804_p5, %p801_p4 }
 0x143   :  { %809 = shalt.err (!%p806_p6)
}
 0x144   :  { %579 = dma.vmem_to_hbm [thread:$0]  %s577_s5, 96, %s1030_s6, [#allocation4]   ;;  %v485_v47 = vmul.f32 %v957_v25, %v436_v39  ;;  %v490_v48 = vmul.f32 %v957_v25, %v446_v40  ;;  %v438_v49 = vmul.f32 %v436_v39, %v963_v29  ;;  %v448_v50 = vmul.f32 %v446_v40, %v963_v29 }
 0x145   :  { %s988_s22 = sld [smem:[#allocation6 + $0x81]]  ;;  %v466_v51 = vmul.f32 %v464_v43, %v963_v29  ;;  %v508_v52 = vmul.f32 %v506_v44, %v965_v31  ;;  %v514_v53 = vmul.f32 %v512_v45, %v965_v31  ;;  %v524_v54 = vmul.f32 %v522_v46, %v965_v31  ;;  %s995_s6 = sld [smem:[#allocation6 + $0x82]] }
 0x146   :  { %v487_v55 = vrot.slane %v485_v47, 1  ;;  %v492_v56 = vrot.slane %v490_v48, 2  ;;  %v440_v57 = vrot.slane %v438_v49, 1  ;;  %v534_v58 = vstv %s961_s14  ;;  %s848_s23 = smov [#allocation8]  }
 0x147   :  { %v450_v59 = vrot.slane %v448_v50, 2  ;;  %v516_v60 = vrot.slane %v514_v53, 1  ;;  %v551_v61 = vmul.f32 %v959_v28, %v506_v44  ;;  %v552_v62 = vmul.f32 %v959_v28, %v512_v45  ;;  %s586_s24 = sshll.u32 %s848_s23, 4  ;;  %s587_s24 = int_to_ptr.vmem [resolvable:$true] %s586_s24 }
 0x148   :  { %v489_v63 = vadd.f32 %v487_v55, %v484_v41  ;;  %v442_v0 = vadd.f32 %v440_v57, %v431_v42  ;;  %v467_v1 = vadd.f32 %v466_v51, %v440_v57  ;;  %v557_v2 = vmul.f32 %v959_v28, %v522_v46  ;;  %s810_s25 = scalar_lea.vmem %s587_s24, 96  ;;  %p815_p8 = scmp.lt.s32.totalorder %s587_s24, %s587_s24 }
 0x149   :  { %v496_v3 = vrot.slane %v957_v25, 3  ;;  %v518_v4 = vadd.f32 %v516_v60, %v508_v52  ;;  %v526_v6 = vrot.slane %v524_v54, 2  ;;  %v554_v7 = vrot.slane %v552_v62, 1  ;;  %p811_p7 = scmp.ne.s32.totalorder %s587_s24, %s810_s25  ;;  %p816_p9 = scmp.lt.s32.totalorder %s810_s25, %s810_s25 }
 0x14a   :  { %v494_v5 = vadd.f32 %v492_v56, %v489_v63  ;;  %v452_v8 = vadd.f32 %v450_v59, %v442_v0  ;;  %v454_v9 = vrot.slane %v963_v29, 3  ;;  %v468_v10 = vadd.f32 %v467_v1, %v450_v59 }
 0x14b   :  { %v528_v11 = vadd.f32 %v526_v6, %v518_v4  ;;  %v530_v12 = vrot.slane %v965_v31, 3  ;;  %v556_v13 = vadd.f32 %v554_v7, %v551_v61  ;;  %v559_v14 = vrot.slane %v557_v2, 2  ;;  %p817_p10 = por %p816_p9, %p815_p8 }
 0x14c   :  { %v498_v15 = vadd.f32 %v496_v3, %v494_v5  ;;  %v456_v16 = vadd.f32 %v454_v9, %v452_v8  ;;  %v469_v17 = vadd.f32 %v468_v10, %v454_v9  ;;  %v538_v18 = vstv %s988_s22 }
 0x14d   :  { %v563_v19 = vrot.slane %v959_v28, 3  ;;  %v532_v20 = vadd.f32 %v530_v12, %v528_v11  ;;  %v561_v21 = vadd.f32 %v559_v14, %v556_v13  ;;  %v567_v25 = vstv %s995_s6  ;;  %p818_p11 = pnand %p817_p10, %p811_p7 }
 0x14e   :  { %v501_v22 = vadd.f32 %v500_v36, %v498_v15  ;;  %v459_v23 = vadd.f32 %v458_v37, %v456_v16  ;;  %v472_v24 = vadd.f32 %v471_v38, %v469_v17 }
 0x14f   :  { %v535_v26 = vadd.f32 %v534_v58, %v532_v20  ;;  %v539_v27 = vadd.f32 %v538_v18, %v532_v20  ;;  %v565_v29 = vadd.f32 %v563_v19, %v561_v21 }
 0x150   :  { %502 = vst [vmem:[#allocation8 + $0x4] sm:$0x1] %v501_v22  ;;  %460 = vst [vmem:[#allocation8] sm:$0x1] %v459_v23  ;;  %v474_v30 = vcombine.high %v472_v24, %v472_v24 }
 0x151   :  { %536 = vst [vmem:[#allocation8 + $0x1] sm:$0x1] %v535_v26  ;;  %v541_v31 = vcombine.high %v539_v27, %v539_v27  ;;  %v568_v28 = vadd.f32 %v567_v25, %v565_v29 }
 0x152   :  { %611 = vst.sshfl [vmem:[#allocation8 + $0x2] sm:$0x1 pattern:$0x76325410] %v474_v30 }
 0x153   :  { %615 = vst.sshfl [vmem:[#allocation8 + $0x3] sm:$0x1 pattern:$0x76325410] %v541_v31  ;;  %569 = vst [vmem:[#allocation8 + $0x5] sm:$0x1] %v568_v28 }
 0x154   :  { %821 = shalt.err (!%p818_p11)
}
 0x155   :  { %s822_s28 = scalar_lea.hbm %s1031_s7, 96 }
 0x156   :  { %p823_p12 = scmp.ne.s32.totalorder %s1031_s7, %s822_s28  ;;  %p826_p13 = scmp.lt.u32.totalorder %s822_s28, %s1031_s7 }
 0x158   :  { %p828_p0 = pnand %p826_p13, %p823_p12 }
 0x15a   :  { %831 = shalt.err (!%p828_p0)
}
 0x15b   :  { %589 = dma.vmem_to_hbm [thread:$0]  %s587_s24, 96, %s1031_s7, [#allocation9]  }
 0x15c   :  { %836 = dma.done.wait [#allocation4], 96  }
 0x15d   :  { %837 = vsyncadd [#allocation4], 4294967200 }
 0x15e   :  { %838 = dma.done.wait [#allocation9], 96  }
 0x15f   :  { %839 = vsyncadd [#allocation9], 4294967200 }
 0x160   :  { %596 = vsyncpa [#allocation3], 1 }
 0x161   :  { %597 = vsyncpa [#allocation4], 1 }
 0x162   :  { %598 = vsyncpa [#allocation9], 1 }
 0x163   :  { %599 = vsyncpa [#allocation5], 1 }

</bundles_post_ra>
